<compile_context>
chip_gen: v7x
topology: tpu7x:2x2x1
jax: 0.10.0
libtpu: 0.0.40
codegen_flags: <defaults>
</compile_context>

<pallas_src>
import jax
import jax.numpy as jnp
from jax.experimental import pallas as pl
from jax.experimental.pallas import tpu as pltpu


def etoy_kernel(nm1_ref, nm2p_ref, e_ref, s_ref, st_ref, w_ref, b_ref, out_ref):
    # nm1_ref:  (B, 1, n)    row node mask
    # nm2p_ref: (B, 1, n*de) col node mask, each entry repeated de times
    # e_ref:    (B, n, n*de) lane-packed edge features (native dtype)
    # s_ref:    (n*de, de)   0/1 selector: S[j*de+k, k] = 1   (group-sum)
    # st_ref:   (de, n*de)   S^T (group-broadcast)
    # w_ref:    (4*de, dy)   Linear weight (in x out)
    # b_ref:    (1, dy)      Linear bias
    # out_ref:  (B, dy)
    n = nm1_ref.shape[2]
    de = s_ref.shape[1]

    E = e_ref[...].astype(jnp.float32)             # (B, n, L), L = n*de
    nm1 = nm1_ref[...].astype(jnp.float32)         # (B, 1, n)
    nm2p = nm2p_ref[...].astype(jnp.float32)       # (B, 1, L)
    S = s_ref[...]
    ST = st_ref[...]

    m1 = nm1[:, 0, :, None]                        # (B, n, 1)
    mk = m1 * nm2p                                 # (B, n, L) packed pairwise mask

    # Number of valid edges; the mask is an outer product so its sum factorizes.
    # divide == 0 (no valid edges) -> inf/nan, matching the PyTorch module.
    divide = jnp.sum(nm1, axis=2) * (jnp.sum(nm2p, axis=2) / float(de))   # (B, 1)

    # --- mean: UNmasked sum / masked count, exactly as in the reference ---
    col_sum = jnp.sum(E, axis=1)                                           # (B, L)
    s_all = jnp.dot(col_sum, S, preferred_element_type=jnp.float32)        # (B, de) MXU group-sum
    m = s_all / divide                                                     # (B, de)

    # --- min / max with the reference-exact +/- 1e5 * (1 - mask) penalty ---
    pen = 100000.0 * (1.0 - mk)                                            # (B, n, L)
    mi_col = jnp.min(E + pen, axis=1)                                      # (B, L)
    ma_col = jnp.max(E - pen, axis=1)                                      # (B, L)

    def group_reduce(x, op):           # (B, L) -> (B, de), tiny intermediates
        acc = x[:, 0:de]
        for j in range(1, n):
            acc = op(acc, x[:, j * de:(j + 1) * de])
        return acc

    mi = group_reduce(mi_col, jnp.minimum)                                 # (B, de)
    ma = group_reduce(ma_col, jnp.maximum)                                 # (B, de)

    # --- variance: reference-exact two-pass sum((E - m)^2 * mask) / divide ---
    m_row = jnp.dot(m, ST, preferred_element_type=jnp.float32)             # (B, L) broadcast-back
    d = E - m_row[:, None, :]                                              # (B, n, L)
    var_col = jnp.sum(d * d * mk, axis=1)                                  # (B, L)
    var = jnp.dot(var_col, S, preferred_element_type=jnp.float32) / divide  # (B, de)

    # --- Linear(4*de -> dy): one MXU dot per block ---
    z = jnp.concatenate([m, mi, ma, var], axis=-1)                         # (B, 4*de)
    out = jnp.dot(z, w_ref[...], preferred_element_type=jnp.float32) + b_ref[...]
    out_ref[...] = out.astype(out_ref.dtype)


def _vmem_capacity_bytes():
    try:
        return int(pltpu.get_tpu_info().vmem_capacity_bytes)
    except Exception:
        return 128 * 1024 * 1024


def etoy_forward(E, e_mask1, e_mask2, W, b):
    """E: (bs, n, n, de); e_mask1: (bs, n, 1, 1); e_mask2: (bs, 1, n, 1).
    W: (4*de, dy); b: (dy,).  Returns (bs, dy)."""
    bs, n, _, de = E.shape
    dy = W.shape[1]
    L = n * de

    # Lane-packed views (free / tiny wrapper-side reshapes; no (bs,n,n,1) mask in HBM).
    E2 = E.reshape(bs, n, L)                                # merge (n, de) -> lane axis
    nm1 = e_mask1.reshape(bs, 1, n).astype(jnp.float32)     # row node mask
    nm2 = e_mask2.reshape(bs, 1, n).astype(jnp.float32)     # col node mask
    nm2p = jnp.repeat(nm2, de, axis=2)                      # (bs, 1, L) lane-tiled
    S = jnp.tile(jnp.eye(de, dtype=jnp.float32), (n, 1))    # (L, de) group-sum selector
    ST = S.T                                                # (de, L) group-broadcast
    b2 = b.reshape(1, dy).astype(jnp.float32)

    # Block-size heuristic: the raw E block is double-buffered and the kernel
    # keeps ~4 block-sized f32 temporaries live; budget half the VMEM limit.
    itemsize = jnp.dtype(E.dtype).itemsize
    vmem_limit = min(_vmem_capacity_bytes() // 2, 64 * 1024 * 1024)  # 64 MiB v5e/v6e, 32 MiB v7x
    bytes_per_batch_elem = n * L * (2 * itemsize + 4 * 4)
    Bblk = max(1, (vmem_limit // 2) // bytes_per_batch_elem)
    if bs >= 16:
        # guarantee >= 2 grid steps so v7x's two TensorCores both get work
        Bblk = min(Bblk, max(8, ((bs // 2) // 8) * 8))
    Bblk = min(Bblk, bs)
    if Bblk < bs:
        # keep the 2-D output block sublane-aligned
        Bblk = min(bs, max(8, (Bblk // 8) * 8))
    grid = (pl.cdiv(bs, Bblk),)

    out = pl.pallas_call(
        etoy_kernel,
        out_shape=jax.ShapeDtypeStruct((bs, dy), jnp.float32),
        grid_spec=pltpu.PrefetchScalarGridSpec(
            num_scalar_prefetch=0,
            grid=grid,
            in_specs=[
                pl.BlockSpec((Bblk, 1, n), lambda i: (i, 0, 0)),    # nm1
                pl.BlockSpec((Bblk, 1, L), lambda i: (i, 0, 0)),    # nm2p
                pl.BlockSpec((Bblk, n, L), lambda i: (i, 0, 0)),    # E (lane-packed)
                pl.BlockSpec((L, de), lambda i: (0, 0)),            # S
                pl.BlockSpec((de, L), lambda i: (0, 0)),            # S^T
                pl.BlockSpec((4 * de, dy), lambda i: (0, 0)),       # W
                pl.BlockSpec((1, dy), lambda i: (0, 0)),            # b
            ],
            out_specs=pl.BlockSpec((Bblk, dy), lambda i: (i, 0)),
        ),
        compiler_params=pltpu.CompilerParams(
            dimension_semantics=("parallel",),          # batch axis independent
            vmem_limit_bytes=int(vmem_limit)),
    )(nm1, nm2p, E2, S, ST, W, b2)
    return out


def ref_forward(E, e_mask1, e_mask2, W, b):
    """Pure-JAX reference, literal transcription of the PyTorch forward."""
    mask = jnp.broadcast_to(e_mask1 * e_mask2, E.shape).astype(jnp.float32)
    float_imask = 1.0 - mask
    divide = jnp.sum(mask, axis=(1, 2))
    m = jnp.sum(E, axis=(1, 2)) / divide
    mi = jnp.min(E + 100000.0 * float_imask, axis=(1, 2))
    ma = jnp.max(E - 100000.0 * float_imask, axis=(1, 2))
    std = jnp.sum((E - m[:, None, None, :]) ** 2 * mask, axis=(1, 2)) / divide
    z = jnp.concatenate([m, mi, ma, std], axis=1)
    return z @ W + b


if __name__ == "__main__":
    key = jax.random.PRNGKey(0)
    bs, n, de, dy = 2, 8, 16, 32  # d = de = 16, dy = 32

    k_e, k_w, k_b = jax.random.split(key, 3)
    E = jax.random.normal(k_e, (bs, n, n, de), dtype=jnp.float32)

    # node mask -> pairwise edge masks, like the PyTorch caller would build them
    n_valid = jnp.array([6, 8])
    node_mask = (jnp.arange(n)[None, :] < n_valid[:, None]).astype(jnp.float32)
    e_mask1 = node_mask[:, :, None, None]   # (bs, n, 1, 1)
    e_mask2 = node_mask[:, None, :, None]   # (bs, 1, n, 1)

    # deterministic Linear(4*d, dy) parameters (PyTorch-style uniform bound)
    bound = 1.0 / jnp.sqrt(jnp.float32(4 * de))
    W = jax.random.uniform(k_w, (4 * de, dy), minval=-bound, maxval=bound,
                           dtype=jnp.float32)
    b = jax.random.uniform(k_b, (dy,), minval=-bound, maxval=bound,
                           dtype=jnp.float32)

    out = etoy_forward(E, e_mask1, e_mask2, W, b)
    out = jax.block_until_ready(out)

    ref = ref_forward(E, e_mask1, e_mask2, W, b)
    assert out.shape == (bs, dy)
    assert jnp.allclose(out, ref, atol=1e-3, rtol=1e-3)
    print("KERNEL_OK")
</pallas_src>

<mosaic_0001>
module attributes {stable_mosaic.version = 11 : i64} {
  func.func @etoy_kernel(%arg0: i32, %arg1: memref<2x1x8xf32, #tpu.memory_space<vmem>>, %arg2: memref<2x1x128xf32, #tpu.memory_space<vmem>>, %arg3: memref<2x8x128xf32, #tpu.memory_space<vmem>>, %arg4: memref<128x16xf32, #tpu.memory_space<vmem>>, %arg5: memref<16x128xf32, #tpu.memory_space<vmem>>, %arg6: memref<64x32xf32, #tpu.memory_space<vmem>>, %arg7: memref<1x32xf32, #tpu.memory_space<vmem>>, %arg8: memref<2x32xf32, #tpu.memory_space<vmem>>) attributes {dimension_semantics = [#tpu.dimension_semantics<parallel>], iteration_bounds = array<i64: 1>, scalar_prefetch = 0 : i64, scratch_operands = 0 : i64, tpu.core_type = #tpu.core_type<tc>, window_params = [{transform_indices = @transform_0, window_bounds = array<i64: 2, 1, 8>}, {transform_indices = @transform_1, window_bounds = array<i64: 2, 1, 128>}, {transform_indices = @transform_2, window_bounds = array<i64: 2, 8, 128>}, {pipeline_mode = #tpu.pipeline_mode<synchronous>, transform_indices = @transform_3, window_bounds = array<i64: 128, 16>}, {pipeline_mode = #tpu.pipeline_mode<synchronous>, transform_indices = @transform_4, window_bounds = array<i64: 16, 128>}, {pipeline_mode = #tpu.pipeline_mode<synchronous>, transform_indices = @transform_5, window_bounds = array<i64: 64, 32>}, {pipeline_mode = #tpu.pipeline_mode<synchronous>, transform_indices = @transform_6, window_bounds = array<i64: 1, 32>}, {transform_indices = @transform_7, window_bounds = array<i64: 2, 32>}]} {
    %c0 = arith.constant 0 : index
    %c0_0 = arith.constant 0 : index
    %c0_1 = arith.constant 0 : index
    %0 = vector.load %arg3[%c0, %c0_0, %c0_1] : memref<2x8x128xf32, #tpu.memory_space<vmem>>, vector<2x8x128xf32>
    %c0_2 = arith.constant 0 : index
    %c0_3 = arith.constant 0 : index
    %c0_4 = arith.constant 0 : index
    %1 = vector.load %arg1[%c0_2, %c0_3, %c0_4] : memref<2x1x8xf32, #tpu.memory_space<vmem>>, vector<2x1x8xf32>
    %c0_5 = arith.constant 0 : index
    %c0_6 = arith.constant 0 : index
    %c0_7 = arith.constant 0 : index
    %2 = vector.load %arg2[%c0_5, %c0_6, %c0_7] : memref<2x1x128xf32, #tpu.memory_space<vmem>>, vector<2x1x128xf32>
    %c0_8 = arith.constant 0 : index
    %c0_9 = arith.constant 0 : index
    %3 = vector.load %arg4[%c0_8, %c0_9] : memref<128x16xf32, #tpu.memory_space<vmem>>, vector<128x16xf32>
    %c0_10 = arith.constant 0 : index
    %c0_11 = arith.constant 0 : index
    %4 = vector.load %arg5[%c0_10, %c0_11] : memref<16x128xf32, #tpu.memory_space<vmem>>, vector<16x128xf32>
    %5 = vector.shape_cast %1 : vector<2x1x8xf32> to vector<2x8xf32>
    %6 = vector.shape_cast %5 : vector<2x8xf32> to vector<2x8x1xf32>
    %7 = vector.broadcast %6 : vector<2x8x1xf32> to vector<2x8x128xf32>
    %8 = vector.broadcast %2 : vector<2x1x128xf32> to vector<2x8x128xf32>
    %9 = arith.mulf %7, %8 : vector<2x8x128xf32>
    %cst = arith.constant dense<0.000000e+00> : vector<2x1xf32>
    %10 = vector.multi_reduction <add>, %1, %cst [2] : vector<2x1x8xf32> to vector<2x1xf32>
    %cst_12 = arith.constant dense<0.000000e+00> : vector<2x1xf32>
    %11 = vector.multi_reduction <add>, %2, %cst_12 [2] : vector<2x1x128xf32> to vector<2x1xf32>
    %cst_13 = arith.constant 1.600000e+01 : f32
    %12 = vector.broadcast %cst_13 : f32 to vector<2x1xf32>
    %13 = arith.divf %11, %12 : vector<2x1xf32>
    %14 = arith.mulf %10, %13 : vector<2x1xf32>
    %cst_14 = arith.constant dense<0.000000e+00> : vector<2x128xf32>
    %15 = vector.multi_reduction <add>, %0, %cst_14 [1] : vector<2x8x128xf32> to vector<2x128xf32>
    %cst_15 = arith.constant dense<0.000000e+00> : vector<2x16xf32>
    %16 = tpu.matmul %15, %3, %cst_15 {dimension_numbers = #tpu.dot_dimension_numbers<[1], [0], [0], [1], [0, 0, 1, 1], [], []>} : vector<2x128xf32>, vector<128x16xf32>, vector<2x16xf32> -> vector<2x16xf32>
    %17 = vector.broadcast %14 : vector<2x1xf32> to vector<2x16xf32>
    %18 = arith.divf %16, %17 : vector<2x16xf32>
    %cst_16 = arith.constant 1.000000e+00 : f32
    %19 = vector.broadcast %cst_16 : f32 to vector<2x8x128xf32>
    %20 = arith.subf %19, %9 : vector<2x8x128xf32>
    %cst_17 = arith.constant 1.000000e+05 : f32
    %21 = vector.broadcast %cst_17 : f32 to vector<2x8x128xf32>
    %22 = arith.mulf %21, %20 : vector<2x8x128xf32>
    %23 = arith.addf %0, %22 : vector<2x8x128xf32>
    %cst_18 = arith.constant dense<0x7F800000> : vector<2x128xf32>
    %24 = vector.multi_reduction <minimumf>, %23, %cst_18 [1] : vector<2x8x128xf32> to vector<2x128xf32>
    %25 = arith.subf %0, %22 : vector<2x8x128xf32>
    %cst_19 = arith.constant dense<0xFF800000> : vector<2x128xf32>
    %26 = vector.multi_reduction <maximumf>, %25, %cst_19 [1] : vector<2x8x128xf32> to vector<2x128xf32>
    %27 = vector.extract_strided_slice %24 {offsets = [0, 0], sizes = [2, 16], strides = [1, 1]} : vector<2x128xf32> to vector<2x16xf32>
    %28 = vector.extract_strided_slice %24 {offsets = [0, 16], sizes = [2, 16], strides = [1, 1]} : vector<2x128xf32> to vector<2x16xf32>
    %29 = arith.minimumf %27, %28 : vector<2x16xf32>
    %30 = vector.extract_strided_slice %24 {offsets = [0, 32], sizes = [2, 16], strides = [1, 1]} : vector<2x128xf32> to vector<2x16xf32>
    %31 = arith.minimumf %29, %30 : vector<2x16xf32>
    %32 = vector.extract_strided_slice %24 {offsets = [0, 48], sizes = [2, 16], strides = [1, 1]} : vector<2x128xf32> to vector<2x16xf32>
    %33 = arith.minimumf %31, %32 : vector<2x16xf32>
    %34 = vector.extract_strided_slice %24 {offsets = [0, 64], sizes = [2, 16], strides = [1, 1]} : vector<2x128xf32> to vector<2x16xf32>
    %35 = arith.minimumf %33, %34 : vector<2x16xf32>
    %36 = vector.extract_strided_slice %24 {offsets = [0, 80], sizes = [2, 16], strides = [1, 1]} : vector<2x128xf32> to vector<2x16xf32>
    %37 = arith.minimumf %35, %36 : vector<2x16xf32>
    %38 = vector.extract_strided_slice %24 {offsets = [0, 96], sizes = [2, 16], strides = [1, 1]} : vector<2x128xf32> to vector<2x16xf32>
    %39 = arith.minimumf %37, %38 : vector<2x16xf32>
    %40 = vector.extract_strided_slice %24 {offsets = [0, 112], sizes = [2, 16], strides = [1, 1]} : vector<2x128xf32> to vector<2x16xf32>
    %41 = arith.minimumf %39, %40 : vector<2x16xf32>
    %42 = vector.extract_strided_slice %26 {offsets = [0, 0], sizes = [2, 16], strides = [1, 1]} : vector<2x128xf32> to vector<2x16xf32>
    %43 = vector.extract_strided_slice %26 {offsets = [0, 16], sizes = [2, 16], strides = [1, 1]} : vector<2x128xf32> to vector<2x16xf32>
    %44 = arith.maximumf %42, %43 : vector<2x16xf32>
    %45 = vector.extract_strided_slice %26 {offsets = [0, 32], sizes = [2, 16], strides = [1, 1]} : vector<2x128xf32> to vector<2x16xf32>
    %46 = arith.maximumf %44, %45 : vector<2x16xf32>
    %47 = vector.extract_strided_slice %26 {offsets = [0, 48], sizes = [2, 16], strides = [1, 1]} : vector<2x128xf32> to vector<2x16xf32>
    %48 = arith.maximumf %46, %47 : vector<2x16xf32>
    %49 = vector.extract_strided_slice %26 {offsets = [0, 64], sizes = [2, 16], strides = [1, 1]} : vector<2x128xf32> to vector<2x16xf32>
    %50 = arith.maximumf %48, %49 : vector<2x16xf32>
    %51 = vector.extract_strided_slice %26 {offsets = [0, 80], sizes = [2, 16], strides = [1, 1]} : vector<2x128xf32> to vector<2x16xf32>
    %52 = arith.maximumf %50, %51 : vector<2x16xf32>
    %53 = vector.extract_strided_slice %26 {offsets = [0, 96], sizes = [2, 16], strides = [1, 1]} : vector<2x128xf32> to vector<2x16xf32>
    %54 = arith.maximumf %52, %53 : vector<2x16xf32>
    %55 = vector.extract_strided_slice %26 {offsets = [0, 112], sizes = [2, 16], strides = [1, 1]} : vector<2x128xf32> to vector<2x16xf32>
    %56 = arith.maximumf %54, %55 : vector<2x16xf32>
    %cst_20 = arith.constant dense<0.000000e+00> : vector<2x128xf32>
    %57 = tpu.matmul %18, %4, %cst_20 {dimension_numbers = #tpu.dot_dimension_numbers<[1], [0], [0], [1], [0, 0, 1, 1], [], []>} : vector<2x16xf32>, vector<16x128xf32>, vector<2x128xf32> -> vector<2x128xf32>
    %58 = vector.shape_cast %57 : vector<2x128xf32> to vector<2x1x128xf32>
    %59 = vector.broadcast %58 : vector<2x1x128xf32> to vector<2x8x128xf32>
    %60 = arith.subf %0, %59 : vector<2x8x128xf32>
    %61 = arith.mulf %60, %60 : vector<2x8x128xf32>
    %62 = arith.mulf %61, %9 : vector<2x8x128xf32>
    %cst_21 = arith.constant dense<0.000000e+00> : vector<2x128xf32>
    %63 = vector.multi_reduction <add>, %62, %cst_21 [1] : vector<2x8x128xf32> to vector<2x128xf32>
    %cst_22 = arith.constant dense<0.000000e+00> : vector<2x16xf32>
    %64 = tpu.matmul %63, %3, %cst_22 {dimension_numbers = #tpu.dot_dimension_numbers<[1], [0], [0], [1], [0, 0, 1, 1], [], []>} : vector<2x128xf32>, vector<128x16xf32>, vector<2x16xf32> -> vector<2x16xf32>
    %65 = vector.broadcast %14 : vector<2x1xf32> to vector<2x16xf32>
    %66 = arith.divf %64, %65 : vector<2x16xf32>
    %67 = tpu.concatenate %18, %41, %56, %66 in 1 : vector<2x16xf32>, vector<2x16xf32>, vector<2x16xf32>, vector<2x16xf32> -> vector<2x64xf32>
    %c0_23 = arith.constant 0 : index
    %c0_24 = arith.constant 0 : index
    %68 = vector.load %arg6[%c0_23, %c0_24] : memref<64x32xf32, #tpu.memory_space<vmem>>, vector<64x32xf32>
    %cst_25 = arith.constant dense<0.000000e+00> : vector<2x32xf32>
    %69 = tpu.matmul %67, %68, %cst_25 {dimension_numbers = #tpu.dot_dimension_numbers<[1], [0], [0], [1], [0, 0, 1, 1], [], []>} : vector<2x64xf32>, vector<64x32xf32>, vector<2x32xf32> -> vector<2x32xf32>
    %c0_26 = arith.constant 0 : index
    %c0_27 = arith.constant 0 : index
    %70 = vector.load %arg7[%c0_26, %c0_27] : memref<1x32xf32, #tpu.memory_space<vmem>>, vector<1x32xf32>
    %71 = vector.broadcast %70 : vector<1x32xf32> to vector<2x32xf32>
    %72 = arith.addf %69, %71 : vector<2x32xf32>
    %c0_28 = arith.constant 0 : index
    %c0_29 = arith.constant 0 : index
    %73 = vector.load %arg8[%c0_28, %c0_29] : memref<2x32xf32, #tpu.memory_space<vmem>>, vector<2x32xf32>
    tpu.vector_store %arg8[%c0_28, %c0_29], %72 {strides = array<i32>} : memref<2x32xf32, #tpu.memory_space<vmem>>, vector<2x32xf32>,
    return
  }
  func.func @transform_0(%arg0: i32) -> (i32, i32, i32) {
    %c0_i32 = arith.constant 0 : i32
    %c0_i32_0 = arith.constant 0 : i32
    %c0_i32_1 = arith.constant 0 : i32
    return %arg0, %c0_i32, %c0_i32_0 : i32, i32, i32
  }
  func.func @transform_1(%arg0: i32) -> (i32, i32, i32) {
    %c0_i32 = arith.constant 0 : i32
    %c0_i32_0 = arith.constant 0 : i32
    %c0_i32_1 = arith.constant 0 : i32
    return %arg0, %c0_i32, %c0_i32_0 : i32, i32, i32
  }
  func.func @transform_2(%arg0: i32) -> (i32, i32, i32) {
    %c0_i32 = arith.constant 0 : i32
    %c0_i32_0 = arith.constant 0 : i32
    %c0_i32_1 = arith.constant 0 : i32
    return %arg0, %c0_i32, %c0_i32_0 : i32, i32, i32
  }
  func.func @transform_3(%arg0: i32) -> (i32, i32) {
    %c0_i32 = arith.constant 0 : i32
    %c0_i32_0 = arith.constant 0 : i32
    %c0_i32_1 = arith.constant 0 : i32
    return %c0_i32, %c0_i32_0 : i32, i32
  }
  func.func @transform_4(%arg0: i32) -> (i32, i32) {
    %c0_i32 = arith.constant 0 : i32
    %c0_i32_0 = arith.constant 0 : i32
    %c0_i32_1 = arith.constant 0 : i32
    return %c0_i32, %c0_i32_0 : i32, i32
  }
  func.func @transform_5(%arg0: i32) -> (i32, i32) {
    %c0_i32 = arith.constant 0 : i32
    %c0_i32_0 = arith.constant 0 : i32
    %c0_i32_1 = arith.constant 0 : i32
    return %c0_i32, %c0_i32_0 : i32, i32
  }
  func.func @transform_6(%arg0: i32) -> (i32, i32) {
    %c0_i32 = arith.constant 0 : i32
    %c0_i32_0 = arith.constant 0 : i32
    %c0_i32_1 = arith.constant 0 : i32
    return %c0_i32, %c0_i32_0 : i32, i32
  }
  func.func @transform_7(%arg0: i32) -> (i32, i32) {
    %c0_i32 = arith.constant 0 : i32
    %c0_i32_0 = arith.constant 0 : i32
    return %arg0, %c0_i32 : i32, i32
  }
}

</mosaic_0001>

<bundles_post_ra>
// kernel: tpu_custom_call.1
= control target key start
LH: loop header
LB: loop body
LE: loop exit
PB: predicated region body
PF: predicated region fallthrough
CT: control target
= control target key end

     0   :  { %12 = vsyncpa [#allocation3], 0  ;;  %s1552_s0 = inlined_call_operand.hbm [shape: f32[2,1,8], index: 0, kind: input, shape index: {}]   ;;  %s1553_s1 = inlined_call_operand.hbm [shape: f32[2,1,128], index: 1, kind: input, shape index: {}]   ;;  %s1554_s2 = inlined_call_operand.hbm [shape: f32[2,8,128], index: 2, kind: input, shape index: {}]   ;;  %s1555_s3 = inlined_call_operand.hbm [shape: f32[128,16], index: 3, kind: input, shape index: {}]   ;;  %s1556_s4 = inlined_call_operand.hbm [shape: f32[16,128], index: 4, kind: input, shape index: {}]   ;;  %s1557_s5 = inlined_call_operand.hbm [shape: f32[64,32], index: 5, kind: input, shape index: {}]   ;;  %s1558_s6 = inlined_call_operand.hbm [shape: f32[1,32], index: 6, kind: input, shape index: {}]   ;;  %s1559_s7 = inlined_call_operand.hbm [shape: f32[2,32], index: 7, kind: output, shape index: {}]  }
   0x1   :  { %13 = vsyncpa [#allocation6], 0 }
   0x2   :  { %14 = vsyncpa [#allocation9], 0 }
   0x3   :  { %15 = vsyncpa [#allocation12], 0 }
   0x4   :  { %16 = vsyncpa [#allocation4], 0  ;;  %s1190_s24 = smov [#allocation5]   ;;  %s1004_s28 = scalar_lea.hbm %s1553_s1, 32 }
   0x5   :  { %s34_s25 = sshll.u32 %s1190_s24, 4  ;;  %p1005_p0 = scmp.ne.s32.totalorder %s1553_s1, %s1004_s28  ;;  %s35_s25 = int_to_ptr.vmem [resolvable:$true] %s34_s25 }
   0x6   :  { %p1008_p1 = scmp.lt.u32.totalorder %s1004_s28, %s1553_s1 }
   0x8   :  { %p1010_p2 = pnand %p1008_p1, %p1005_p0 }
   0xa   :  { %1013 = shalt.err (!%p1010_p2)
}
   0xb   :  { %s1014_s10 = scalar_lea.vmem %s35_s25, 32  ;;  %p1019_p4 = scmp.lt.s32.totalorder %s35_s25, %s35_s25 }
   0xc   :  { %p1015_p3 = scmp.ne.s32.totalorder %s35_s25, %s1014_s10  ;;  %p1020_p5 = scmp.lt.s32.totalorder %s1014_s10, %s1014_s10 }
   0xe   :  { %p1021_p6 = por %p1020_p5, %p1019_p4 }
  0x10   :  { %p1022_p7 = pnand %p1021_p6, %p1015_p3 }
  0x12   :  { %1025 = shalt.err (!%p1022_p7)
}
  0x13   :  { %s1191_s11 = smov 16   ;;  %s1192_s12 = smov 1  }
  0x14   :  { %40 = dma.hbm_to_vmem [thread:$0]  %s1553_s1, 32, %s35_s25, [#allocation6], %s1191_s11, %s1191_s11, %s1192_s12  }
  0x15   :  { %s1193_s15 = smov [#allocation8]   ;;  %s1194_s17 = smov [#allocation11]  }
  0x16   :  { %s58_s16 = sshll.u32 %s1193_s15, 4  ;;  %s82_s18 = sshll.u32 %s1194_s17, 4  ;;  %s59_s16 = int_to_ptr.vmem [resolvable:$true] %s58_s16  ;;  %s83_s18 = int_to_ptr.vmem [resolvable:$true] %s82_s18 }
  0x17   :  { %s1026_s21 = scalar_lea.hbm %s1555_s3, 2048 }
  0x18   :  { %p1027_p8 = scmp.ne.s32.totalorder %s1555_s3, %s1026_s21  ;;  %p1030_p9 = scmp.lt.u32.totalorder %s1026_s21, %s1555_s3 }
  0x1a   :  { %p1032_p10 = pnand %p1030_p9, %p1027_p8 }
  0x1c   :  { %1035 = shalt.err (!%p1032_p10)
}
  0x1d   :  { %s1036_s1 = scalar_lea.vmem %s59_s16, 2048  ;;  %p1041_p12 = scmp.lt.s32.totalorder %s59_s16, %s59_s16 }
  0x1e   :  { %p1037_p11 = scmp.ne.s32.totalorder %s59_s16, %s1036_s1  ;;  %p1042_p13 = scmp.lt.s32.totalorder %s1036_s1, %s1036_s1 }
  0x20   :  { %p1043_p0 = por %p1042_p13, %p1041_p12 }
  0x22   :  { %p1044_p1 = pnand %p1043_p0, %p1037_p11 }
  0x24   :  { %1047 = shalt.err (!%p1044_p1)
}
  0x25   :  { %s1195_s25 = smov 128   ;;  %s1196_s27 = smov 8  }
  0x26   :  { %64 = dma.hbm_to_vmem [thread:$0]  %s1555_s3, 2048, %s59_s16, [#allocation9], %s1195_s25, %s1195_s25, %s1196_s27  }
  0x27   :  { %s1048_s9 = scalar_lea.hbm %s1557_s5, 1024 }
  0x28   :  { %p1049_p2 = scmp.ne.s32.totalorder %s1557_s5, %s1048_s9  ;;  %p1052_p3 = scmp.lt.u32.totalorder %s1048_s9, %s1557_s5 }
  0x2a   :  { %p1054_p4 = pnand %p1052_p3, %p1049_p2 }
  0x2c   :  { %1057 = shalt.err (!%p1054_p4)
}
  0x2d   :  { %s1058_s17 = scalar_lea.vmem %s83_s18, 1024  ;;  %p1063_p6 = scmp.lt.s32.totalorder %s83_s18, %s83_s18 }
  0x2e   :  { %p1059_p5 = scmp.ne.s32.totalorder %s83_s18, %s1058_s17  ;;  %p1064_p7 = scmp.lt.s32.totalorder %s1058_s17, %s1058_s17 }
  0x30   :  { %p1065_p8 = por %p1064_p7, %p1063_p6 }
  0x32   :  { %p1066_p9 = pnand %p1065_p8, %p1059_p5 }
  0x34   :  { %1069 = shalt.err (!%p1066_p9)
}
  0x35   :  { %88 = dma.hbm_to_vmem [thread:$0]  %s1557_s5, 1024, %s83_s18, [#allocation12], %s1195_s25, %s1195_s25, %s1196_s27  }
  0x36   :  { %s1197_s19 = smov [#allocation2]   ;;  %s1198_s21 = smov [#allocation7]  }
  0x37   :  { %s22_s20 = sshll.u32 %s1197_s19, 4  ;;  %s46_s22 = sshll.u32 %s1198_s21, 4  ;;  %s23_s20 = int_to_ptr.vmem [resolvable:$true] %s22_s20  ;;  %s47_s22 = int_to_ptr.vmem [resolvable:$true] %s46_s22 }
  0x38   :  { %s1070_s26 = scalar_lea.hbm %s1552_s0, 32 }
  0x39   :  { %p1071_p10 = scmp.ne.s32.totalorder %s1552_s0, %s1070_s26  ;;  %p1074_p11 = scmp.lt.u32.totalorder %s1070_s26, %s1552_s0 }
  0x3b   :  { %p1076_p12 = pnand %p1074_p11, %p1071_p10 }
  0x3d   :  { %1079 = shalt.err (!%p1076_p12)
}
  0x3e   :  { %s1080_s5 = scalar_lea.vmem %s23_s20, 32  ;;  %p1085_p0 = scmp.lt.s32.totalorder %s23_s20, %s23_s20 }
  0x3f   :  { %p1081_p13 = scmp.ne.s32.totalorder %s23_s20, %s1080_s5  ;;  %p1086_p1 = scmp.lt.s32.totalorder %s1080_s5, %s1080_s5 }
  0x41   :  { %p1087_p2 = por %p1086_p1, %p1085_p0 }
  0x43   :  { %p1088_p3 = pnand %p1087_p2, %p1081_p13 }
  0x45   :  { %1091 = shalt.err (!%p1088_p3)
}
  0x46   :  { %28 = dma.hbm_to_vmem [thread:$0]  %s1552_s0, 32, %s23_s20, [#allocation3], %s1191_s11, %s1191_s11, %s1192_s12  }
  0x47   :  { %s1092_s13 = scalar_lea.hbm %s1554_s2, 256 }
  0x48   :  { %p1093_p4 = scmp.ne.s32.totalorder %s1554_s2, %s1092_s13  ;;  %p1096_p5 = scmp.lt.u32.totalorder %s1092_s13, %s1554_s2 }
  0x4a   :  { %p1098_p6 = pnand %p1096_p5, %p1093_p4 }
  0x4c   :  { %1101 = shalt.err (!%p1098_p6)
}
  0x4d   :  { %s1102_s16 = scalar_lea.vmem %s47_s22, 256  ;;  %p1107_p8 = scmp.lt.s32.totalorder %s47_s22, %s47_s22 }
  0x4e   :  { %p1103_p7 = scmp.ne.s32.totalorder %s47_s22, %s1102_s16  ;;  %p1108_p9 = scmp.lt.s32.totalorder %s1102_s16, %s1102_s16 }
  0x50   :  { %p1109_p10 = por %p1108_p9, %p1107_p8 }
  0x52   :  { %p1110_p11 = pnand %p1109_p10, %p1103_p7 }
  0x54   :  { %1113 = shalt.err (!%p1110_p11)
}
  0x55   :  { %52 = dma.hbm_to_vmem [thread:$0]  %s1554_s2, 256, %s47_s22, [#allocation6], %s1195_s25, %s1195_s25, %s1196_s27  }
  0x56   :  { %s1199_s19 = smov [#allocation10]   ;;  %s1200_s21 = smov [#allocation13]  }
  0x57   :  { %s70_s20 = sshll.u32 %s1199_s19, 4  ;;  %s95_s23 = sshll.u32 %s1200_s21, 4  ;;  %s71_s20 = int_to_ptr.vmem [resolvable:$true] %s70_s20  ;;  %s96_s23 = int_to_ptr.vmem [resolvable:$true] %s95_s23 }
  0x58   :  { %s1114_s1 = scalar_lea.hbm %s1556_s4, 256 }
  0x59   :  { %p1115_p12 = scmp.ne.s32.totalorder %s1556_s4, %s1114_s1  ;;  %p1118_p13 = scmp.lt.u32.totalorder %s1114_s1, %s1556_s4 }
  0x5b   :  { %p1120_p0 = pnand %p1118_p13, %p1115_p12 }
  0x5d   :  { %1123 = shalt.err (!%p1120_p0)
}
  0x5e   :  { %s1124_s2 = scalar_lea.vmem %s71_s20, 256  ;;  %p1129_p2 = scmp.lt.s32.totalorder %s71_s20, %s71_s20 }
  0x5f   :  { %p1125_p1 = scmp.ne.s32.totalorder %s71_s20, %s1124_s2  ;;  %p1130_p3 = scmp.lt.s32.totalorder %s1124_s2, %s1124_s2 }
  0x61   :  { %p1131_p4 = por %p1130_p3, %p1129_p2 }
  0x63   :  { %p1132_p5 = pnand %p1131_p4, %p1125_p1 }
  0x65   :  { %1135 = shalt.err (!%p1132_p5)
}
  0x66   :  { %76 = dma.hbm_to_vmem [thread:$0]  %s1556_s4, 256, %s71_s20, [#allocation9], %s1195_s25, %s1195_s25, %s1196_s27  }
  0x67   :  { %s1136_s10 = scalar_lea.hbm %s1558_s6, 16 }
  0x68   :  { %p1137_p6 = scmp.ne.s32.totalorder %s1558_s6, %s1136_s10  ;;  %p1140_p7 = scmp.lt.u32.totalorder %s1136_s10, %s1558_s6 }
  0x6a   :  { %p1142_p8 = pnand %p1140_p7, %p1137_p6 }
  0x6c   :  { %1145 = shalt.err (!%p1142_p8)
}
  0x6d   :  { %s1146_s3 = scalar_lea.vmem %s96_s23, 16  ;;  %s1150_s16 = scalar_lea.vmem %s96_s23, 32 }
  0x6e   :  { %p1147_p9 = scmp.ne.s32.totalorder %s96_s23, %s1146_s3  ;;  %p1151_p10 = scmp.lt.s32.totalorder %s96_s23, %s96_s23 }
  0x6f   :  { %p1152_p11 = scmp.lt.s32.totalorder %s1150_s16, %s1146_s3 }
  0x71   :  { %p1153_p12 = por %p1152_p11, %p1151_p10 }
  0x73   :  { %p1154_p13 = pnand %p1153_p12, %p1147_p9 }
  0x75   :  { %1157 = shalt.err (!%p1154_p13)
}
  0x76   :  { %98 = dma.hbm_to_vmem [thread:$0]  %s1558_s6, 16, %s96_s23, [#allocation12]  }
  0x77   :  { %1180 = dma.done.wait [#allocation3], 32  }
  0x78   :  { %1181 = vsyncadd [#allocation3], 4294967264 }
  0x79   :  { %1182 = dma.done.wait [#allocation6], 288  }
  0x7a   :  { %1183 = vsyncadd [#allocation6], 4294967008 }
  0x7b   :  { %1184 = dma.done.wait [#allocation9], 2304  }
  0x7c   :  { %1185 = vsyncadd [#allocation9], 4294964992 }
  0x7d   :  { %1186 = dma.done.wait [#allocation12], 1040  }
  0x7e   :  { %1187 = vsyncadd [#allocation12], 4294966256  ;;  %v1201_v0 = vmov 0.0|0.0   ;;  %vm1202_vm0 = vmmov 0   ;;  %v1203_v1 = vmov 0.0   ;;  %vm172_vm1 = vcmask 57344  }
  0x7f   :  { %917 = vmatprep.subr.bf16.mxu0 %v1201_v0  ;;  %941 = vmatprep.subr.bf16.mxu1 %v1201_v0  ;;  %vm179_vm2 = vcmask 1040384   ;;  %v1360_v2 = vld [vmem:[#allocation2] sm:$0x1]  ;;  %v126_v3 = vld [vmem:[#allocation8] sm:$0xff]  ;;  %v1366_v7 = vld [vmem:[#allocation5] sm:$0x1]  ;;  %v144_v19 = vlaneseq }
  0x80   :  { %853 = vmatprep.mubr.msk.f32.mxu0 %vm1202_vm0, %v1203_v1  ;;  %860 = vmatprep.mubr.msk.f32.mxu1 %vm1202_vm0, %v1203_v1  ;;  %v127_v4 = vld [vmem:[#allocation8 + $0x8] sm:$0xff]  ;;  %v173_v5 = vsel %vm172_vm1, %v1360_v2, 0.0  ;;  %v128_v9 = vld [vmem:[#allocation8 + $0x10] sm:$0xff]  ;;  %v180_v10 = vsel %vm179_vm2, %v1366_v7, 0.0  ;;  %v129_v11 = vld [vmem:[#allocation8 + $0x18] sm:$0xff]  ;;  %vm205_vm3 = vcmask 1041409  }
  0x81   :  { %v1364_v6 = vpack.c.bf16 %v127_v4, %v126_v3  ;;  %v123_v8 = vld [vmem:[#allocation2 + $0x1] sm:$0x1]  ;;  %174 = vadd.xlane.f32.xlu1 %v173_v5  ;;  %v1370_v12 = vld [vmem:[#allocation5 + $0x1] sm:$0x1]  ;;  %181 = vadd.xlane.f32.xlu0 %v180_v10  ;;  %v1374_v14 = vpack.c.bf16 %v129_v11, %v128_v9  ;;  %v130_v16 = vld [vmem:[#allocation8 + $0x20] sm:$0xff]  ;;  %v1389_v26 = vshrl.u32 %v144_v19, 7 }
  0x82   :  { %v176_v13 = vsel %vm172_vm1, %v123_v8, 0.0  ;;  %v183_v15 = vsel %vm179_vm2, %v1370_v12, 0.0  ;;  %v131_v17 = vld [vmem:[#allocation8 + $0x28] sm:$0xff]  ;;  %v1379_v18 = vld [vmem:[#allocation7] sm:$0xff]  ;;  %v1384_v21 = vld [vmem:[#allocation7 + $0x8] sm:$0xff]  ;;  %s1204_s6 = smov 112  }
  0x83   :  { %919 = vmatpush3.bf16.msra.mxu0 %v1364_v6  ;;  %v1382_v20 = vpack.c.bf16 %v131_v17, %v130_v16  ;;  %v191_v22 = vrot.slane %v1379_v18, 4  ;;  %v132_v23 = vld [vmem:[#allocation8 + $0x30] sm:$0xff]  ;;  %v133_v24 = vld [vmem:[#allocation8 + $0x38] sm:$0xff]  ;;  %v197_v25 = vrot.slane %v1384_v21, 4  ;;  %v134_v30 = vld [vmem:[#allocation8 + $0x40] sm:$0xff]  ;;  %v1398_v32 = vsub.s32 0, %v1389_v26 }
  0x84   :  { %920 = vmatprep.subr.bf16.mxu0 %v1201_v0  ;;  %v1392_v27 = vpack.c.bf16 %v133_v24, %v132_v23  ;;  %v135_v31 = vld [vmem:[#allocation8 + $0x48] sm:$0xff]  ;;  %v136_v36 = vld [vmem:[#allocation8 + $0x50] sm:$0xff]  ;;  %v137_v37 = vld [vmem:[#allocation8 + $0x58] sm:$0xff]  ;;  %s1205_s27 = smov 96   ;;  %s1206_s0 = smov 80   ;;  %vm440_vm4 = vcmask 130048  }
  0x85   :  { %177 = vadd.xlane.f32.xlu1 %v176_v13  ;;  %184 = vadd.xlane.f32.xlu0 %v183_v15  ;;  %v192_v28 = vadd.f32 %v191_v22, %v1379_v18  ;;  %v198_v29 = vadd.f32 %v197_v25, %v1384_v21  ;;  %v1401_v33 = vpack.c.bf16 %v135_v31, %v134_v30  ;;  %v138_v42 = vld [vmem:[#allocation8 + $0x60] sm:$0xff]  ;;  %v139_v43 = vld [vmem:[#allocation8 + $0x68] sm:$0xff]  ;;  %v140_v47 = vld [vmem:[#allocation8 + $0x70] sm:$0xff]  ;;  %s1207_s12 = smov 64   ;;  %s1208_s19 = smov 48   ;;  %vm659_vm5 = vcmask 261120  }
  0x86   :  { %v1405_v38 = vpack.c.bf16 %v137_v37, %v136_v36  ;;  %v154_v41 = vrot.slane %v123_v8, %v1398_v32  ;;  %v1410_v44 = vpack.c.bf16 %v139_v43, %v138_v42  ;;  %v141_v48 = vld [vmem:[#allocation8 + $0x78] sm:$0xff]  ;;  %v147_v49 = vrot.slane %v1360_v2, %v1398_v32  ;;  %v142_v54 = vld [vmem:[#allocation10] sm:$0xff]  ;;  %v143_v55 = vld [vmem:[#allocation10 + $0x8] sm:$0xff]  ;;  %s1209_s20 = smov 32  }
  0x87   :  { %922 = vmatpush3.bf16.msra.mxu0 %v1374_v14  ;;  %v193_v34 = vrot.slane %v192_v28, 2  ;;  %v199_v35 = vrot.slane %v198_v29, 2  ;;  %v1416_v50 = vpack.c.bf16 %v141_v48, %v140_v47  ;;  %v942_v56 = vpack.c.bf16 %v143_v55, %v142_v54 }
  0x88   :  { %923 = vmatprep.subr.bf16.mxu0 %v1201_v0  ;;  %v167_v63 = vrot.slane %v1370_v12, %v1398_v32  ;;  %v163_v2 = vrot.slane %v1366_v7, %v1398_v32  ;;  %vm661_vm6 = vcmask 392192   ;;  %vm678_vm7 = vcmask 523264  }
  0x89   :  { %v194_v39 = vadd.f32 %v193_v34, %v192_v28  ;;  %v200_v40 = vadd.f32 %v199_v35, %v198_v29  ;;  %943 = vmatpush3.bf16.msra.mxu1 %v942_v56  ;;  %vm752_vm8 = vcmask 254976  }
  0x8a   :  { %944 = vmatprep.subr.bf16.mxu1 %v1201_v0 }
  0x8b   :  { %925 = vmatpush3.bf16.msra.mxu0 %v1382_v20  ;;  %v195_v45 = vrot.slane %v194_v39, 1  ;;  %v201_v46 = vrot.slane %v200_v40, 1 }
  0x8c   :  { %926 = vmatprep.subr.bf16.mxu0 %v1201_v0 }
  0x8d   :  { %v196_v51 = vadd.f32 %v195_v45, %v194_v39  ;;  %v202_v52 = vadd.f32 %v201_v46, %v200_v40 }
  0x8f   :  { %928 = vmatpush3.bf16.msra.mxu0 %v1392_v27  ;;  %v206_v53 = vsel %vm205_vm3, %v202_v52, %v196_v51 }
  0x90   :  { %929 = vmatprep.subr.bf16.mxu0 %v1201_v0 }
  0x93   :  { %931 = vmatpush3.bf16.msra.mxu0 %v1401_v33 }
  0x94   :  { %932 = vmatprep.subr.bf16.mxu0 %v1201_v0 }
  0x96   :  { %156 = vbcast.lane.b32.xlu1 %v154_v41, 256 }
  0x97   :  { %934 = vmatpush3.bf16.msra.mxu0 %v1405_v38 }
  0x98   :  { %935 = vmatprep.subr.bf16.mxu0 %v1201_v0 }
  0x9b   :  { %937 = vmatpush3.bf16.msra.mxu0 %v1410_v44  ;;  %149 = vbcast.lane.b32.xlu0 %v147_v49, 256 }
  0x9c   :  { %938 = vmatprep.subr.bf16.mxu0 %v1201_v0 }
  0x9f   :  { %940 = vmatpush3.bf16.msra.mxu0 %v1416_v50 }
  0xa0   :  { %968 = vmatprep.subr.bf16.mxu0 %v1201_v0 }
  0xa2   :  { %854 = vmatmul.mubr.f32.vlgmr.msra.gmra.mrb[0].mxu0 %v206_v53 }
  0xa3   :  { %914 = vmatprep.mubr.msk.f32.mxu0 %vm1202_vm0, %v1203_v1 }
 0x10e   :  { %v175_v57 = vpop.xlane.xlu1 %174  ;;  %v182_v58 = vpop.xlane.xlu0 %181 }
 0x10f   :  { %v187_v59 = vmul.f32 0.0625, %v182_v58 }
 0x111   :  { %v189_v60 = vmul.f32 %v187_v59, %v175_v57 }
 0x112   :  { %v178_v61 = vpop.xlane.xlu1 %177  ;;  %v185_v62 = vpop.xlane.xlu0 %184 }
 0x113   :  { %v188_v3 = vmul.f32 0.0625, %v185_v62  ;;  %v281_v4 = vrot.slane %v189_v60, %v1398_v32 }
 0x115   :  { %v190_v5 = vmul.f32 %v188_v3, %v178_v61 }
 0x116   :  { %v157_v8 = vpop.permute.xlu1 %156  ;;  %v150_v10 = vpop.permute.xlu0 %149 }
 0x117   :  { %v1430_v9 = vmul.f32 %v167_v63, %v157_v8  ;;  %v285_v11 = vrot.slane %v190_v5, %v1398_v32  ;;  %v1433_v13 = vmul.f32 %v163_v2, %v150_v10 }
 0x119   :  { %v293_v15 = vsub.f32 1.0, %v1430_v9  ;;  %v1437_v16 = vsel %vm205_vm3, %v285_v11, %v281_v4  ;;  %v292_v12 = vsub.f32 1.0, %v1433_v13 }
 0x11a   :  { %1002 = vrcp.f32 %v1437_v16 }
 0x11b   :  { %v295_v7 = vmul.f32 100000.0, %v293_v15  ;;  %v294_v17 = vmul.f32 100000.0, %v292_v12 }
 0x11d   :  { %v297_v19 = vadd.f32 %v295_v7, %v1384_v21  ;;  %v311_v22 = vsub.f32 %v1384_v21, %v295_v7  ;;  %v296_v23 = vadd.f32 %v294_v17, %v1379_v18  ;;  %v310_v24 = vsub.f32 %v1379_v18, %v294_v17 }
 0x11f   :  { %v304_v25 = vrot.slane %v297_v19, 4  ;;  %v318_v28 = vrot.slane %v311_v22, 4  ;;  %v298_v29 = vrot.slane %v296_v23, 4  ;;  %v312_v30 = vrot.slane %v310_v24, 4 }
 0x121   :  { %v305_v31 = vmin.f32 %v297_v19, %v304_v25  ;;  %v319_v34 = vmax.f32 %v311_v22, %v318_v28  ;;  %v299_v35 = vmin.f32 %v296_v23, %v298_v29  ;;  %v313_v36 = vmax.f32 %v310_v24, %v312_v30 }
 0x123   :  { %v306_v37 = vrot.slane %v305_v31, 2  ;;  %v320_v39 = vrot.slane %v319_v34, 2  ;;  %v300_v40 = vrot.slane %v299_v35, 2  ;;  %v314_v41 = vrot.slane %v313_v36, 2 }
 0x124   :  { %v1493_v56 = vpop.eup %1002 }
 0x125   :  { %v307_v42 = vmin.f32 %v305_v31, %v306_v37  ;;  %v321_v43 = vmax.f32 %v319_v34, %v320_v39  ;;  %v301_v45 = vmin.f32 %v299_v35, %v300_v40  ;;  %v315_v46 = vmax.f32 %v313_v36, %v314_v41 }
 0x127   :  { %v308_v47 = vrot.slane %v307_v42, 1  ;;  %v322_v48 = vrot.slane %v321_v43, 1  ;;  %v302_v49 = vrot.slane %v301_v45, 1  ;;  %v316_v51 = vrot.slane %v315_v46, 1 }
 0x129   :  { %v1444_v52 = vmin.f32 %v307_v42, %v308_v47  ;;  %v1446_v53 = vmin.f32 %v301_v45, %v302_v49  ;;  %v1448_v54 = vmax.f32 %v321_v43, %v322_v48  ;;  %v1451_v55 = vmax.f32 %v315_v46, %v316_v51 }
 0x12b   :  { %328 = vrot.lane.b32.xlu1 %v1444_v52, %s1204_s6  ;;  %326 = vrot.lane.b32.xlu0 %v1446_v53, %s1204_s6 }
 0x12f   :  { %386 = vrot.lane.b32.xlu1 %v1448_v54, %s1204_s6  ;;  %384 = vrot.lane.b32.xlu0 %v1451_v55, %s1204_s6 }
 0x133   :  { %336 = vrot.lane.b32.xlu1 %v1444_v52, %s1205_s27  ;;  %334 = vrot.lane.b32.xlu0 %v1446_v53, %s1205_s27 }
 0x137   :  { %394 = vrot.lane.b32.xlu1 %v1448_v54, %s1205_s27  ;;  %392 = vrot.lane.b32.xlu0 %v1451_v55, %s1205_s27 }
 0x13b   :  { %344 = vrot.lane.b32.xlu1 %v1444_v52, %s1206_s0  ;;  %342 = vrot.lane.b32.xlu0 %v1446_v53, %s1206_s0 }
 0x13f   :  { %402 = vrot.lane.b32.xlu1 %v1448_v54, %s1206_s0  ;;  %400 = vrot.lane.b32.xlu0 %v1451_v55, %s1206_s0 }
 0x143   :  { %352 = vrot.lane.b32.xlu1 %v1444_v52, %s1207_s12  ;;  %350 = vrot.lane.b32.xlu0 %v1446_v53, %s1207_s12 }
 0x147   :  { %410 = vrot.lane.b32.xlu1 %v1448_v54, %s1207_s12  ;;  %408 = vrot.lane.b32.xlu0 %v1451_v55, %s1207_s12 }
 0x14b   :  { %360 = vrot.lane.b32.xlu1 %v1444_v52, %s1208_s19  ;;  %358 = vrot.lane.b32.xlu0 %v1446_v53, %s1208_s19 }
 0x14f   :  { %418 = vrot.lane.b32.xlu1 %v1448_v54, %s1208_s19  ;;  %416 = vrot.lane.b32.xlu0 %v1451_v55, %s1208_s19 }
 0x153   :  { %368 = vrot.lane.b32.xlu1 %v1444_v52, %s1209_s20  ;;  %366 = vrot.lane.b32.xlu0 %v1446_v53, %s1209_s20 }
 0x157   :  { %426 = vrot.lane.b32.xlu1 %v1448_v54, %s1209_s20  ;;  %424 = vrot.lane.b32.xlu0 %v1451_v55, %s1209_s20 }
 0x15b   :  { %376 = vrot.lane.b32.xlu1 %v1444_v52, %s1191_s11  ;;  %374 = vrot.lane.b32.xlu0 %v1446_v53, %s1191_s11 }
 0x15f   :  { %434 = vrot.lane.b32.xlu1 %v1448_v54, %s1191_s11 }
 0x163   :  { %432 = vrot.lane.b32.xlu1 %v1451_v55, %s1191_s11 }
 0x175   :  { %v274_v57 = vpop.f32.mrb[0].mxu0 }
 0x176   :  { %v1496_v58 = vmul.f32 %v1493_v56, %v274_v57  ;;  %v855_v59 = vpop.f32.mrb[1].mxu0 }
 0x178   :  { %861 = vmatmul.mubr.msk.f32.vlgmr.msra.gmra.mrb[0].mxu1 %vm440_vm4, %v1496_v58 }
 0x179   :  { %946 = vmatpush3.bf16.msra.mxu1 %v1364_v6  ;;  %895 = vmatprep.mubr.msk.f32.mxu1 %vm1202_vm0, %v1203_v1 }
 0x17a   :  { %947 = vmatprep.subr.bf16.mxu1 %v1201_v0 }
 0x17d   :  { %949 = vmatpush3.bf16.msra.mxu1 %v1374_v14 }
 0x17e   :  { %950 = vmatprep.subr.bf16.mxu1 %v1201_v0 }
 0x181   :  { %952 = vmatpush3.bf16.msra.mxu1 %v1382_v20 }
 0x182   :  { %953 = vmatprep.subr.bf16.mxu1 %v1201_v0 }
 0x185   :  { %955 = vmatpush3.bf16.msra.mxu1 %v1392_v27 }
 0x186   :  { %956 = vmatprep.subr.bf16.mxu1 %v1201_v0 }
 0x189   :  { %958 = vmatpush3.bf16.msra.mxu1 %v1401_v33 }
 0x18a   :  { %959 = vmatprep.subr.bf16.mxu1 %v1201_v0 }
 0x18d   :  { %961 = vmatpush3.bf16.msra.mxu1 %v1405_v38 }
 0x18e   :  { %962 = vmatprep.subr.bf16.mxu1 %v1201_v0 }
 0x191   :  { %964 = vmatpush3.bf16.msra.mxu1 %v1410_v44 }
 0x192   :  { %965 = vmatprep.subr.bf16.mxu1 %v1201_v0 }
 0x195   :  { %967 = vmatpush3.bf16.msra.mxu1 %v1416_v50 }
 0x19d   :  { %v329_v1 = vpop.permute.xlu1 %328  ;;  %v327_v6 = vpop.permute.xlu0 %326 }
 0x19e   :  { %v333_v4 = vmin.f32 %v1444_v52, %v329_v1  ;;  %v332_v5 = vmin.f32 %v1446_v53, %v327_v6 }
 0x1a1   :  { %v387_v14 = vpop.permute.xlu1 %386  ;;  %v385_v20 = vpop.permute.xlu0 %384 }
 0x1a2   :  { %v391_v50 = vmax.f32 %v1448_v54, %v387_v14  ;;  %v390_v12 = vmax.f32 %v1451_v55, %v385_v20 }
 0x1a5   :  { %v337_v27 = vpop.permute.xlu1 %336  ;;  %v335_v60 = vpop.permute.xlu0 %334 }
 0x1a6   :  { %v341_v10 = vmin.f32 %v333_v4, %v337_v27  ;;  %v340_v15 = vmin.f32 %v332_v5, %v335_v60  ;;  %v1210_v60 = vmov 1966171168  }
 0x1a9   :  { %v395_v61 = vpop.permute.xlu1 %394  ;;  %v393_v33 = vpop.permute.xlu0 %392 }
 0x1aa   :  { %v399_v7 = vmax.f32 %v391_v50, %v395_v61  ;;  %v398_v24 = vmax.f32 %v390_v12, %v393_v33  ;;  %v516_v61 = vunpack.c.l.s4 %v1210_v60 }
 0x1ac   :  { %v517_v33 = vunpack.c.0.s8 %v516_v61 }
 0x1ad   :  { %v345_v62 = vpop.permute.xlu1 %344  ;;  %v343_v63 = vpop.permute.xlu0 %342 }
 0x1ae   :  { %v349_v17 = vmin.f32 %v341_v10, %v345_v62  ;;  %v348_v22 = vmin.f32 %v340_v15, %v343_v63  ;;  %v520_v62 = vsub.s32 %v517_v33, %v1389_v26 }
 0x1b1   :  { %v403_v2 = vpop.permute.xlu1 %402  ;;  %v401_v38 = vpop.permute.xlu0 %400 }
 0x1b2   :  { %v407_v25 = vmax.f32 %v399_v7, %v403_v2  ;;  %v406_v34 = vmax.f32 %v398_v24, %v401_v38 }
 0x1b5   :  { %v353_v3 = vpop.permute.xlu1 %352  ;;  %v351_v44 = vpop.permute.xlu0 %350 }
 0x1b6   :  { %v357_v28 = vmin.f32 %v349_v17, %v353_v3  ;;  %v356_v30 = vmin.f32 %v348_v22, %v351_v44 }
 0x1b9   :  { %v411_v8 = vpop.permute.xlu1 %410  ;;  %v409_v11 = vpop.permute.xlu0 %408 }
 0x1ba   :  { %v415_v35 = vmax.f32 %v407_v25, %v411_v8  ;;  %v414_v41 = vmax.f32 %v406_v34, %v409_v11 }
 0x1bd   :  { %v361_v16 = vpop.permute.xlu1 %360  ;;  %v359_v19 = vpop.permute.xlu0 %358 }
 0x1be   :  { %v365_v36 = vmin.f32 %v357_v28, %v361_v16  ;;  %v364_v39 = vmin.f32 %v356_v30, %v359_v19  ;;  %v663_v30 = vld [vmem:[#allocation11] sm:$0xff] }
 0x1c1   :  { %v419_v23 = vpop.permute.xlu1 %418  ;;  %v417_v29 = vpop.permute.xlu0 %416 }
 0x1c2   :  { %v423_v42 = vmax.f32 %v415_v35, %v419_v23  ;;  %v422_v48 = vmax.f32 %v414_v41, %v417_v29  ;;  %v670_v41 = vld [vmem:[#allocation11 + $0x38] sm:$0xff] }
 0x1c5   :  { %v369_v31 = vpop.permute.xlu1 %368  ;;  %v367_v37 = vpop.permute.xlu0 %366 }
 0x1c6   :  { %v373_v43 = vmin.f32 %v365_v36, %v369_v31  ;;  %v372_v46 = vmin.f32 %v364_v39, %v367_v37  ;;  %v664_v31 = vld [vmem:[#allocation11 + $0x8] sm:$0xff]  ;;  %v667_v36 = vld [vmem:[#allocation11 + $0x20] sm:$0xff] }
 0x1c7   :  { %v969_v34 = vpack.c.bf16 %v664_v31, %v663_v30  ;;  %v668_v37 = vld [vmem:[#allocation11 + $0x28] sm:$0xff] }
 0x1c8   :  { %v975_v39 = vpack.c.bf16 %v668_v37, %v667_v36 }
 0x1c9   :  { %v427_v40 = vpop.permute.xlu1 %426  ;;  %v425_v45 = vpop.permute.xlu0 %424  ;;  %970 = vmatpush3.bf16.msra.mxu0 %v969_v34 }
 0x1ca   :  { %v431_v49 = vmax.f32 %v423_v42, %v427_v40  ;;  %v430_v57 = vmax.f32 %v422_v48, %v425_v45  ;;  %971 = vmatprep.subr.bf16.mxu0 %v1201_v0  ;;  %v669_v40 = vld [vmem:[#allocation11 + $0x30] sm:$0xff] }
 0x1cb   :  { %v978_v42 = vpack.c.bf16 %v670_v41, %v669_v40 }
 0x1cd   :  { %v377_v47 = vpop.permute.xlu1 %376  ;;  %v375_v52 = vpop.permute.xlu0 %374 }
 0x1ce   :  { %v381_v51 = vmin.f32 %v373_v43, %v377_v47  ;;  %v380_v53 = vmin.f32 %v372_v46, %v375_v52 }
 0x1d0   :  { %v642_v54 = vrot.slane %v381_v51, 7 }
 0x1d1   :  { %v435_v55 = vpop.permute.xlu1 %434 }
 0x1d2   :  { %v439_v59 = vmax.f32 %v431_v49, %v435_v55  ;;  %v643_v1 = vsel %vm205_vm3, %v642_v54, %v380_v53 }
 0x1d3   :  { %644 = vrot.lane.b32.xlu0 %v643_v1, %s1191_s11  ;;  %s1211_s11 = smov [#allocation14]  }
 0x1d4   :  { %v649_v6 = vrot.slane %v439_v59, 7  ;;  %s760_s21 = sshll.u32 %s1211_s11, 4  ;;  %s761_s21 = int_to_ptr.vmem [resolvable:$true] %s760_s21 }
 0x1d5   :  { %v433_v14 = vpop.permute.xlu1 %432  ;;  %s1158_s23 = scalar_lea.vmem %s761_s21, 32  ;;  %p1163_p1 = scmp.lt.s32.totalorder %s761_s21, %s761_s21 }
 0x1d6   :  { %v438_v20 = vmax.f32 %v430_v57, %v433_v14  ;;  %p1159_p0 = scmp.ne.s32.totalorder %s761_s21, %s1158_s23  ;;  %p1164_p2 = scmp.lt.s32.totalorder %s1158_s23, %s1158_s23 }
 0x1d8   :  { %v650_v27 = vsel %vm205_vm3, %v649_v6, %v438_v20  ;;  %p1165_p3 = por %p1164_p2, %p1163_p1 }
 0x1d9   :  { %651 = vrot.lane.b32.xlu1 %v650_v27, %s1209_s20 }
 0x1da   :  { %p1166_p4 = pnand %p1165_p3, %p1159_p0 }
 0x245   :  { %v645_v47 = vpop.permute.xlu0 %644 }
 0x246   :  { %v658_v49 = vsel %vm440_vm4, %v1496_v58, %v645_v47 }
 0x24b   :  { %v510_v63 = vpop.f32.mrb[0].mxu1  ;;  %v652_v48 = vpop.permute.xlu1 %651 }
 0x24c   :  { %v521_v2 = vrot.slane %v510_v63, %v520_v62  ;;  %v862_v38 = vpop.f32.mrb[1].mxu1  ;;  %v660_v51 = vsel %vm659_vm5, %v658_v49, %v652_v48 }
 0x24e   :  { %v522_v3 = vcombine.high %v521_v2, %v521_v2  ;;  %v529_v4 = vrot.slane %v521_v2, %v520_v62 }
 0x250   :  { %v536_v44 = vrot.slane %v522_v3, %v520_v62  ;;  %v540_v5 = vrot.slane %v529_v4, %v1398_v32 }
 0x252   :  { %v544_v8 = vrot.slane %v536_v44, %v1398_v32  ;;  %v547_v50 = vsub.f32 %v1379_v18, %v540_v5 }
 0x254   :  { %v548_v10 = vsub.f32 %v1384_v21, %v544_v8  ;;  %v549_v11 = vmul.f32 %v547_v50, %v547_v50 }
 0x256   :  { %v550_v15 = vmul.f32 %v548_v10, %v548_v10  ;;  %v551_v16 = vmul.f32 %v549_v11, %v1433_v13  ;;  %v665_v13 = vld [vmem:[#allocation11 + $0x10] sm:$0xff] }
 0x258   :  { %v552_v26 = vmul.f32 %v550_v15, %v1430_v9  ;;  %v553_v12 = vrot.slane %v551_v16, 4  ;;  %v666_v9 = vld [vmem:[#allocation11 + $0x18] sm:$0xff] }
 0x259   :  { %v972_v35 = vpack.c.bf16 %v666_v9, %v665_v13 }
 0x25a   :  { %v554_v7 = vadd.f32 %v553_v12, %v551_v16  ;;  %v559_v17 = vrot.slane %v552_v26, 4 }
 0x25b   :  { %973 = vmatpush3.bf16.msra.mxu0 %v972_v35 }
 0x25c   :  { %v555_v19 = vrot.slane %v554_v7, 2  ;;  %v560_v22 = vadd.f32 %v559_v17, %v552_v26  ;;  %974 = vmatprep.subr.bf16.mxu0 %v1201_v0 }
 0x25e   :  { %v556_v23 = vadd.f32 %v555_v19, %v554_v7  ;;  %v561_v24 = vrot.slane %v560_v22, 2 }
 0x25f   :  { %976 = vmatpush3.bf16.msra.mxu0 %v975_v39 }
 0x260   :  { %v557_v25 = vrot.slane %v556_v23, 1  ;;  %v562_v28 = vadd.f32 %v561_v24, %v560_v22  ;;  %977 = vmatprep.subr.bf16.mxu0 %v1201_v0  ;;  %v773_v0 = vld [vmem:[#allocation13] ss:$0 sm:$0xff] }
 0x262   :  { %v563_v32 = vrot.slane %v562_v28, 1  ;;  %v558_v29 = vadd.f32 %v557_v25, %v556_v23 }
 0x263   :  { %979 = vmatpush3.bf16.msra.mxu0 %v978_v42 }
 0x264   :  { %v564_v18 = vadd.f32 %v563_v32, %v562_v28 }
 0x266   :  { %v567_v21 = vsel %vm205_vm3, %v564_v18, %v558_v29 }
 0x267   :  { %896 = vmatmul.mubr.f32.vlgmr.msra.gmra.mrb[2].mxu1 %v567_v21 }
 0x33a   :  { %v635_v43 = vpop.f32.mrb[2].mxu1 }
 0x33b   :  { %v639_v45 = vmul.f32 %v1493_v56, %v635_v43  ;;  %v897_v46 = vpop.f32.mrb[3].mxu1 }
 0x33d   :  { %655 = vrot.lane.b32.xlu0 %v639_v45, %s1208_s19 }
 0x3af   :  { %v656_v52 = vpop.permute.xlu0 %655 }
 0x3b0   :  { %v662_v53 = vsel %vm661_vm6, %v660_v51, %v656_v52 }
 0x3b1   :  { %915 = vmatmul.mubr.msk.f32.vlgmr.msra.gmra.mrb[2].mxu0 %vm678_vm7, %v662_v53 }
 0x484   :  { %v748_v54 = vpop.f32.mrb[2].mxu0 }
 0x485   :  { %v749_v56 = vadd.f32 %v773_v0, %v748_v54  ;;  %v916_v55 = vpop.f32.mrb[3].mxu0 }
 0x487   :  { %753 = vst.msk [vmem:[#allocation14] sm:$0x3] %vm752_vm8, %v749_v56 }
 0x488   :  { %1169 = shalt.err (!%p1166_p4)
}
 0x489   :  { %s1170_s1 = scalar_lea.hbm %s1559_s7, 32 }
 0x48a   :  { %p1171_p5 = scmp.ne.s32.totalorder %s1559_s7, %s1170_s1  ;;  %p1174_p6 = scmp.lt.u32.totalorder %s1170_s1, %s1559_s7 }
 0x48c   :  { %p1176_p7 = pnand %p1174_p6, %p1171_p5 }
 0x48e   :  { %1179 = shalt.err (!%p1176_p7)
}
 0x48f   :  { %763 = dma.vmem_to_hbm [thread:$0]  %s761_s21, 32, %s1559_s7, [#allocation4]  }
 0x490   :  { %1188 = dma.done.wait [#allocation4], 32  }
 0x491   :  { %1189 = vsyncadd [#allocation4], 4294967264 }
 0x492   :  { %767 = vsyncpa [#allocation3], 1 }
 0x493   :  { %768 = vsyncpa [#allocation6], 1 }
 0x494   :  { %769 = vsyncpa [#allocation9], 1 }
 0x495   :  { %770 = vsyncpa [#allocation12], 1 }
 0x496   :  { %771 = vsyncpa [#allocation4], 1 }

</bundles_post_ra>
